<compile_context>
chip_gen: v5e
topology: v5e:2x2
jax: 0.10.0
libtpu: 0.0.40
codegen_flags: <defaults>
</compile_context>

<pallas_src>
import functools

import jax
import jax.numpy as jnp
from jax.experimental import pallas as pl
from jax.experimental.pallas import tpu as pltpu

LOG_SIG_MAX = 2.0
LOG_SIG_MIN = -20.0
HIDDEN = 256
HEAD_PAD = 128          # lane-dense fused-head width (must be >= 2 * action_dim)
MAX_BLOCK_B = 512       # per-tile batch rows cap (weights stay VMEM-resident anyway)


def _round_up(x, m):
    return ((x + m - 1) // m) * m


def _num_tensorcores():
    """Best-effort TC count per chip (2 on v7x, 1 on v5e/v6e)."""
    try:
        return int(getattr(jax.devices()[0], "num_cores", 1) or 1)
    except Exception:  # pragma: no cover - defensive
        return 1


def _pick_block_b(batch, min_blocks):
    """Batch tile: multiple of 16, minimal tail padding, >= min_blocks tiles."""
    bp = _round_up(max(int(batch), 1), 16)
    if bp <= 16:
        return 16
    n_blocks = max(int(min_blocks), -(-bp // MAX_BLOCK_B))
    bb = _round_up(-(-bp // n_blocks), 16)
    return min(bb, bp)


def _reverse_actor_kernel(x_ref, w1_ref, b1_ref, w2_ref, b2_ref,
                          wh_ref, bh_ref, out_ref, *, action_dim):
    # bf16 MXU operands, f32 accumulation, f32 elementwise.
    x = x_ref[...]
    h1 = jnp.dot(x, w1_ref[...], preferred_element_type=jnp.float32) + b1_ref[...]
    h1 = jnp.maximum(h1, 0.0)

    h2 = jnp.dot(h1.astype(jnp.bfloat16), w2_ref[...],
                 preferred_element_type=jnp.float32) + b2_ref[...]
    h2 = jnp.maximum(h2, 0.0)

    # Fused heads, lane-dense: cols [0, A) = mean, [A, 2A) = log_std, rest = 0.
    heads = jnp.dot(h2.astype(jnp.bfloat16), wh_ref[...],
                    preferred_element_type=jnp.float32) + bh_ref[...]

    # Clamp the log_std half only (column mask on the VPU; padded zero columns
    # are clamped too, which leaves them at 0 — harmless, they are discarded).
    col = jax.lax.broadcasted_iota(jnp.int32, heads.shape, 1)
    clamped = jnp.clip(heads, LOG_SIG_MIN, LOG_SIG_MAX)
    heads = jnp.where(col >= action_dim, clamped, heads)

    out_ref[...] = heads.astype(out_ref.dtype)


def pack_params(params):
    """One-time parameter prep: fuse + zero-pad heads, cast matmul weights to bf16.

    Returns (packed_arrays_tuple, action_dim).
    """
    w1, b1, w2, b2, wm, bm, wls, bls = params
    action_dim = int(wm.shape[1])
    assert 2 * action_dim <= HEAD_PAD, "action_dim too large for HEAD_PAD"

    wh = jnp.zeros((HIDDEN, HEAD_PAD), jnp.float32)
    wh = wh.at[:, :action_dim].set(wm)
    wh = wh.at[:, action_dim:2 * action_dim].set(wls)
    bh = jnp.zeros((1, HEAD_PAD), jnp.float32)
    bh = bh.at[:, :action_dim].set(jnp.reshape(bm, (1, -1)))
    bh = bh.at[:, action_dim:2 * action_dim].set(jnp.reshape(bls, (1, -1)))

    packed = (
        w1.astype(jnp.bfloat16),
        jnp.reshape(b1, (1, -1)).astype(jnp.float32),
        w2.astype(jnp.bfloat16),
        jnp.reshape(b2, (1, -1)).astype(jnp.float32),
        wh.astype(jnp.bfloat16),
        bh.astype(jnp.float32),
    )
    return packed, action_dim


@functools.partial(jax.jit, static_argnames=("action_dim", "block_b"))
def reverse_actor_forward(state, packed_params, action_dim, block_b=None):
    """ReverseActor.forward: returns (mean, log_std), each [B, action_dim]."""
    w1b, b1f, w2b, b2f, whb, bhf = packed_params
    B, state_dim = state.shape

    if block_b is None:
        block_b = _pick_block_b(B, _num_tensorcores())
    else:
        block_b = _round_up(int(block_b), 16)
    B_pad = _round_up(B, block_b)

    x = state.astype(jnp.bfloat16)
    if B_pad != B:
        x = jnp.pad(x, ((0, B_pad - B), (0, 0)))

    grid = (B_pad // block_b,)

    const = lambda shape: pl.BlockSpec(shape, lambda i: tuple(0 for _ in shape))

    flops = 2 * B_pad * (state_dim * HIDDEN + HIDDEN * HIDDEN + HIDDEN * HEAD_PAD)
    bytes_accessed = (
        x.size * 2                                         # bf16 activations in
        + (w1b.size + w2b.size + whb.size) * 2             # bf16 weights
        + (b1f.size + b2f.size + bhf.size) * 4             # f32 biases
        + B_pad * HEAD_PAD * 4                             # f32 output
    )
    cost = pl.CostEstimate(flops=flops, transcendentals=0,
                           bytes_accessed=bytes_accessed)

    out = pl.pallas_call(
        functools.partial(_reverse_actor_kernel, action_dim=action_dim),
        out_shape=jax.ShapeDtypeStruct((B_pad, HEAD_PAD), jnp.float32),
        grid=grid,
        in_specs=[
            pl.BlockSpec((block_b, state_dim), lambda i: (i, 0)),  # batch-tiled
            const(w1b.shape), const(b1f.shape),                    # VMEM-resident
            const(w2b.shape), const(b2f.shape),
            const(whb.shape), const(bhf.shape),
        ],
        out_specs=pl.BlockSpec((block_b, HEAD_PAD), lambda i: (i, 0)),
        compiler_params=pltpu.CompilerParams(
            dimension_semantics=("parallel",)),
        cost_estimate=cost,
    )(x, w1b, b1f, w2b, b2f, whb, bhf)

    mean = out[:B, :action_dim]
    log_std = out[:B, action_dim:2 * action_dim]
    return mean, log_std


def init_params(key, state_dim, action_dim):
    """Deterministic init mirroring nn.Linear shapes (stored as [in, out])."""
    ks = jax.random.split(key, 8)

    def linear(kw, kb, fan_in, fan_out):
        bound = 1.0 / jnp.sqrt(fan_in)
        w = jax.random.uniform(kw, (fan_in, fan_out), jnp.float32, -bound, bound)
        b = jax.random.uniform(kb, (1, fan_out), jnp.float32, -bound, bound)
        return w, b

    w1, b1 = linear(ks[0], ks[1], state_dim, HIDDEN)
    w2, b2 = linear(ks[2], ks[3], HIDDEN, HIDDEN)
    wm, bm = linear(ks[4], ks[5], HIDDEN, action_dim)
    wls, bls = linear(ks[6], ks[7], HIDDEN, action_dim)
    return (w1, b1, w2, b2, wm, bm, wls, bls)


def reverse_actor_forward_ref_f32(state, params):
    """Plain-JAX f32 reference of ReverseActor.forward."""
    w1, b1, w2, b2, wm, bm, wls, bls = params
    a = jnp.maximum(state @ w1 + b1, 0.0)
    a = jnp.maximum(a @ w2 + b2, 0.0)
    mean = a @ wm + bm
    log_std = jnp.clip(a @ wls + bls, LOG_SIG_MIN, LOG_SIG_MAX)
    return mean, log_std


def reverse_actor_forward_ref_bf16(state, params):
    """Plain-JAX reference using the same bf16-operand / f32-accumulate math."""
    w1, b1, w2, b2, wm, bm, wls, bls = params
    bf = jnp.bfloat16
    dot = lambda a, b: jnp.dot(a.astype(bf), b.astype(bf),
                               preferred_element_type=jnp.float32)
    a = jnp.maximum(dot(state, w1) + b1, 0.0)
    a = jnp.maximum(dot(a, w2) + b2, 0.0)
    mean = dot(a, wm) + bm
    log_std = jnp.clip(dot(a, wls) + bls, LOG_SIG_MIN, LOG_SIG_MAX)
    return mean, log_std


if __name__ == "__main__":
    key = jax.random.PRNGKey(0)
    k_params, k_state, k_state_big = jax.random.split(key, 3)

    B, state_dim, action_dim = 8, 16, 8
    params = init_params(k_params, state_dim, action_dim)
    packed, adim = pack_params(params)
    state = jax.random.normal(k_state, (B, state_dim), jnp.float32)

    mean, log_std = reverse_actor_forward(state, packed, adim)
    jax.block_until_ready((mean, log_std))
    assert mean.shape == (B, action_dim) and log_std.shape == (B, action_dim)

    # Tight check vs. a reference doing the identical bf16-operand math.
    mean_bf, log_std_bf = reverse_actor_forward_ref_bf16(state, params)
    assert jnp.allclose(mean, mean_bf, atol=1e-4, rtol=1e-4)
    assert jnp.allclose(log_std, log_std_bf, atol=1e-4, rtol=1e-4)

    # Loose check vs. the pure-f32 reference (bf16 operand rounding only,
    # intentional: SAC tolerates it).
    mean_f32, log_std_f32 = reverse_actor_forward_ref_f32(state, params)
    assert jnp.allclose(mean, mean_f32, atol=5e-2, rtol=5e-2)
    assert jnp.allclose(log_std, log_std_f32, atol=5e-2, rtol=5e-2)

    # Larger, non-aligned batch: exercises 16-row rounding, minimal tail
    # padding, multi-step grid (on 2-TC parts) and VMEM-resident weights.
    B2 = 300
    state2 = jax.random.normal(k_state_big, (B2, state_dim), jnp.float32)
    mean2, log_std2 = reverse_actor_forward(state2, packed, adim)
    jax.block_until_ready((mean2, log_std2))
    mean2_bf, log_std2_bf = reverse_actor_forward_ref_bf16(state2, params)
    assert mean2.shape == (B2, action_dim) and log_std2.shape == (B2, action_dim)
    assert jnp.allclose(mean2, mean2_bf, atol=1e-4, rtol=1e-4)
    assert jnp.allclose(log_std2, log_std2_bf, atol=1e-4, rtol=1e-4)

    print("KERNEL_OK")
</pallas_src>

<mosaic_0001>
module attributes {stable_mosaic.version = 11 : i64} {
  func.func @_reverse_actor_kernel(%arg0: i32, %arg1: memref<16x16xbf16, #tpu.memory_space<vmem>>, %arg2: memref<16x256xbf16, #tpu.memory_space<vmem>>, %arg3: memref<1x256xf32, #tpu.memory_space<vmem>>, %arg4: memref<256x256xbf16, #tpu.memory_space<vmem>>, %arg5: memref<1x256xf32, #tpu.memory_space<vmem>>, %arg6: memref<256x128xbf16, #tpu.memory_space<vmem>>, %arg7: memref<1x128xf32, #tpu.memory_space<vmem>>, %arg8: memref<16x128xf32, #tpu.memory_space<vmem>>) attributes {dimension_semantics = [#tpu.dimension_semantics<parallel>], iteration_bounds = array<i64: 1>, scalar_prefetch = 0 : i64, scratch_operands = 0 : i64, tpu.core_type = #tpu.core_type<tc>, window_params = [{transform_indices = @transform_0, window_bounds = array<i64: 16, 16>}, {pipeline_mode = #tpu.pipeline_mode<synchronous>, transform_indices = @transform_1, window_bounds = array<i64: 16, 256>}, {pipeline_mode = #tpu.pipeline_mode<synchronous>, transform_indices = @transform_2, window_bounds = array<i64: 1, 256>}, {pipeline_mode = #tpu.pipeline_mode<synchronous>, transform_indices = @transform_3, window_bounds = array<i64: 256, 256>}, {pipeline_mode = #tpu.pipeline_mode<synchronous>, transform_indices = @transform_4, window_bounds = array<i64: 1, 256>}, {pipeline_mode = #tpu.pipeline_mode<synchronous>, transform_indices = @transform_5, window_bounds = array<i64: 256, 128>}, {pipeline_mode = #tpu.pipeline_mode<synchronous>, transform_indices = @transform_6, window_bounds = array<i64: 1, 128>}, {transform_indices = @transform_7, window_bounds = array<i64: 16, 128>}]} {
    %c0 = arith.constant 0 : index
    %c0_0 = arith.constant 0 : index
    %0 = vector.load %arg1[%c0, %c0_0] : memref<16x16xbf16, #tpu.memory_space<vmem>>, vector<16x16xbf16>
    %c0_1 = arith.constant 0 : index
    %c0_2 = arith.constant 0 : index
    %1 = vector.load %arg2[%c0_1, %c0_2] : memref<16x256xbf16, #tpu.memory_space<vmem>>, vector<16x256xbf16>
    %cst = arith.constant dense<0.000000e+00> : vector<16x256xf32>
    %2 = tpu.matmul %0, %1, %cst {dimension_numbers = #tpu.dot_dimension_numbers<[1], [0], [0], [1], [0, 0, 1, 1], [], []>} : vector<16x16xbf16>, vector<16x256xbf16>, vector<16x256xf32> -> vector<16x256xf32>
    %c0_3 = arith.constant 0 : index
    %c0_4 = arith.constant 0 : index
    %3 = vector.load %arg3[%c0_3, %c0_4] : memref<1x256xf32, #tpu.memory_space<vmem>>, vector<1x256xf32>
    %4 = vector.broadcast %3 : vector<1x256xf32> to vector<16x256xf32>
    %5 = arith.addf %2, %4 : vector<16x256xf32>
    %cst_5 = arith.constant 0.000000e+00 : f32
    %6 = vector.broadcast %cst_5 : f32 to vector<16x256xf32>
    %7 = arith.maximumf %5, %6 : vector<16x256xf32>
    %8 = arith.truncf %7 : vector<16x256xf32> to vector<16x256xbf16>
    %c0_6 = arith.constant 0 : index
    %c0_7 = arith.constant 0 : index
    %9 = vector.load %arg4[%c0_6, %c0_7] : memref<256x256xbf16, #tpu.memory_space<vmem>>, vector<256x256xbf16>
    %cst_8 = arith.constant dense<0.000000e+00> : vector<16x256xf32>
    %10 = tpu.matmul %8, %9, %cst_8 {dimension_numbers = #tpu.dot_dimension_numbers<[1], [0], [0], [1], [0, 0, 1, 1], [], []>} : vector<16x256xbf16>, vector<256x256xbf16>, vector<16x256xf32> -> vector<16x256xf32>
    %c0_9 = arith.constant 0 : index
    %c0_10 = arith.constant 0 : index
    %11 = vector.load %arg5[%c0_9, %c0_10] : memref<1x256xf32, #tpu.memory_space<vmem>>, vector<1x256xf32>
    %12 = vector.broadcast %11 : vector<1x256xf32> to vector<16x256xf32>
    %13 = arith.addf %10, %12 : vector<16x256xf32>
    %cst_11 = arith.constant 0.000000e+00 : f32
    %14 = vector.broadcast %cst_11 : f32 to vector<16x256xf32>
    %15 = arith.maximumf %13, %14 : vector<16x256xf32>
    %16 = arith.truncf %15 : vector<16x256xf32> to vector<16x256xbf16>
    %c0_12 = arith.constant 0 : index
    %c0_13 = arith.constant 0 : index
    %17 = vector.load %arg6[%c0_12, %c0_13] : memref<256x128xbf16, #tpu.memory_space<vmem>>, vector<256x128xbf16>
    %cst_14 = arith.constant dense<0.000000e+00> : vector<16x128xf32>
    %18 = tpu.matmul %16, %17, %cst_14 {dimension_numbers = #tpu.dot_dimension_numbers<[1], [0], [0], [1], [0, 0, 1, 1], [], []>} : vector<16x256xbf16>, vector<256x128xbf16>, vector<16x128xf32> -> vector<16x128xf32>
    %c0_15 = arith.constant 0 : index
    %c0_16 = arith.constant 0 : index
    %19 = vector.load %arg7[%c0_15, %c0_16] : memref<1x128xf32, #tpu.memory_space<vmem>>, vector<1x128xf32>
    %20 = vector.broadcast %19 : vector<1x128xf32> to vector<16x128xf32>
    %21 = arith.addf %18, %20 : vector<16x128xf32>
    %22 = tpu.iota {dimensions = array<i32: 1>} : vector<16x128xi32>
    %cst_17 = arith.constant -2.000000e+01 : f32
    %cst_18 = arith.constant 2.000000e+00 : f32
    %23 = vector.broadcast %cst_17 : f32 to vector<16x128xf32>
    %24 = arith.maximumf %23, %21 : vector<16x128xf32>
    %25 = vector.broadcast %cst_18 : f32 to vector<16x128xf32>
    %26 = arith.minimumf %25, %24 : vector<16x128xf32>
    %c8_i32 = arith.constant 8 : i32
    %27 = vector.broadcast %c8_i32 : i32 to vector<16x128xi32>
    %28 = arith.cmpi sge, %22, %27 : vector<16x128xi32>
    %29 = arith.select %28, %26, %21 : vector<16x128xi1>, vector<16x128xf32>
    %c0_19 = arith.constant 0 : index
    %c0_20 = arith.constant 0 : index
    %30 = vector.load %arg8[%c0_19, %c0_20] : memref<16x128xf32, #tpu.memory_space<vmem>>, vector<16x128xf32>
    tpu.vector_store %arg8[%c0_19, %c0_20], %29 {strides = array<i32>} : memref<16x128xf32, #tpu.memory_space<vmem>>, vector<16x128xf32>,
    return
  }
  func.func @transform_0(%arg0: i32) -> (i32, i32) {
    %c0_i32 = arith.constant 0 : i32
    %c0_i32_0 = arith.constant 0 : i32
    return %arg0, %c0_i32 : i32, i32
  }
  func.func @transform_1(%arg0: i32) -> (i32, i32) {
    %c0_i32 = arith.constant 0 : i32
    %c0_i32_0 = arith.constant 0 : i32
    %c0_i32_1 = arith.constant 0 : i32
    return %c0_i32, %c0_i32_0 : i32, i32
  }
  func.func @transform_2(%arg0: i32) -> (i32, i32) {
    %c0_i32 = arith.constant 0 : i32
    %c0_i32_0 = arith.constant 0 : i32
    %c0_i32_1 = arith.constant 0 : i32
    return %c0_i32, %c0_i32_0 : i32, i32
  }
  func.func @transform_3(%arg0: i32) -> (i32, i32) {
    %c0_i32 = arith.constant 0 : i32
    %c0_i32_0 = arith.constant 0 : i32
    %c0_i32_1 = arith.constant 0 : i32
    return %c0_i32, %c0_i32_0 : i32, i32
  }
  func.func @transform_4(%arg0: i32) -> (i32, i32) {
    %c0_i32 = arith.constant 0 : i32
    %c0_i32_0 = arith.constant 0 : i32
    %c0_i32_1 = arith.constant 0 : i32
    return %c0_i32, %c0_i32_0 : i32, i32
  }
  func.func @transform_5(%arg0: i32) -> (i32, i32) {
    %c0_i32 = arith.constant 0 : i32
    %c0_i32_0 = arith.constant 0 : i32
    %c0_i32_1 = arith.constant 0 : i32
    return %c0_i32, %c0_i32_0 : i32, i32
  }
  func.func @transform_6(%arg0: i32) -> (i32, i32) {
    %c0_i32 = arith.constant 0 : i32
    %c0_i32_0 = arith.constant 0 : i32
    %c0_i32_1 = arith.constant 0 : i32
    return %c0_i32, %c0_i32_0 : i32, i32
  }
  func.func @transform_7(%arg0: i32) -> (i32, i32) {
    %c0_i32 = arith.constant 0 : i32
    %c0_i32_0 = arith.constant 0 : i32
    return %arg0, %c0_i32 : i32, i32
  }
}

</mosaic_0001>

<bundles_post_ra>
// kernel: reverse_actor_forward.1
= control target key start
LH: loop header
LB: loop body
LE: loop exit
PB: predicated region body
PF: predicated region fallthrough
CT: control target
= control target key end

     0   :  { %12 = vsyncpa [#allocation3], 0  ;;  %s959_s0 = inlined_call_operand.vmem [shape: bf16[16,16], index: 0, kind: input, shape index: {}]   ;;  %s960_s1 = inlined_call_operand.vmem [shape: bf16[16,256], index: 1, kind: input, shape index: {}]   ;;  %s961_s2 = inlined_call_operand.vmem [shape: f32[1,256], index: 2, kind: input, shape index: {}]   ;;  %s962_s3 = inlined_call_operand.hbm [shape: bf16[256,256], index: 3, kind: input, shape index: {}]   ;;  %s963_s4 = inlined_call_operand.vmem [shape: f32[1,256], index: 4, kind: input, shape index: {}]   ;;  %s964_s5 = inlined_call_operand.hbm [shape: bf16[256,128], index: 5, kind: input, shape index: {}]   ;;  %s965_s6 = inlined_call_operand.vmem [shape: f32[1,128], index: 6, kind: input, shape index: {}]   ;;  %s966_s7 = inlined_call_operand.vmem [shape: f32[16,128], index: 7, kind: output, shape index: {}]  }
   0x1   :  { %s24_s26 = sshll.u32 %s962_s3, 4  ;;  %s25_s26 = int_to_ptr.hbm [resolvable:$true] %s24_s26 }
   0x2   :  { %13 = vsyncpa [#allocation5], 0  ;;  %s875_s27 = smov [#allocation2]   ;;  %s39_s8 = sshll.u32 %s964_s5, 4  ;;  %s40_s8 = int_to_ptr.hbm [resolvable:$true] %s39_s8 }
   0x3   :  { %s26_s28 = sshll.u32 %s875_s27, 4  ;;  %s876_s9 = smov 128   ;;  %s27_s28 = int_to_ptr.vmem [resolvable:$true] %s26_s28 }
   0x4   :  { %s877_s10 = smov 8   ;;  %s878_s11 = smov [#allocation4]  }
   0x5   :  { %32 = dma.hbm_to_vmem [thread:$0]  %s25_s26, 4096, %s27_s28, [#allocation3], %s876_s9, %s876_s9, %s877_s10  }
   0x6   :  { %s41_s12 = sshll.u32 %s878_s11, 4  ;;  %s879_s13 = smov 64   ;;  %s42_s12 = int_to_ptr.vmem [resolvable:$true] %s41_s12 }
   0x7   :  { %s880_s14 = smov 4  }
   0x8   :  { %47 = dma.hbm_to_vmem [thread:$0]  %s40_s8, 2048, %s42_s12, [#allocation5], %s879_s13, %s879_s13, %s880_s14  }
   0x9   :  { %871 = dma.done.wait [#allocation3], 4096  }
   0xa   :  { %872 = vsyncadd [#allocation3], 4294963200 }
   0xb   :  { %873 = dma.done.wait [#allocation5], 2048  }
   0xc   :  { %874 = vsyncadd [#allocation5], 4294965248  ;;  %v565_v0 = vld [vmem:[%s960_s1] sm:$0xf]  ;;  %v767_v1 = vld [vmem:[%s960_s1 + $0x4] sm:$0xf0] }
   0xd   :  { %v766_v2 = vld [vmem:[%s960_s1 + $0x4] sm:$0xf]  ;;  %v566_v3 = vor.u32 %v767_v1, %v565_v0  ;;  %v567_v4 = vld [vmem:[%s960_s1 + $0x8] sm:$0xf0]  ;;  %vm84_vm0 = vcmask 130048  }
   0xe   :  { %v765_v5 = vld [vmem:[%s959_s0] sm:$0xff]  ;;  %v631_v6 = vld [vmem:[#allocation2 + $0x70] sm:$0xf]  ;;  %v570_v7 = vor.u32 %v766_v2, %v567_v4  ;;  %v783_v8 = vld [vmem:[#allocation2 + $0x74] sm:$0xf0] }
   0xf   :  { %v695_v9 = vld [vmem:[#allocation2 + $0xf0] sm:$0xf]  ;;  %v799_v10 = vld [vmem:[#allocation2 + $0xf4] sm:$0xf0]  ;;  %95 = vmatpush.bf16.msra.mxu0 %v566_v3  ;;  %v632_v11 = vor.u32 %v783_v8, %v631_v6  ;;  %v782_v13 = vld [vmem:[#allocation2 + $0x74] sm:$0xf] }
  0x10   :  { %v696_v12 = vor.u32 %v799_v10, %v695_v9  ;;  %v633_v14 = vld [vmem:[#allocation2 + $0x78] sm:$0xf0]  ;;  %v798_v15 = vld [vmem:[#allocation2 + $0xf4] sm:$0xf]  ;;  %109 = vmatpush.bf16.msra.mxu1 %v570_v7  ;;  %v623_v18 = vld [vmem:[#allocation2 + $0x60] sm:$0xf] }
  0x11   :  { %v636_v16 = vor.u32 %v782_v13, %v633_v14  ;;  %v697_v17 = vld [vmem:[#allocation2 + $0xf8] sm:$0xf0]  ;;  %v781_v19 = vld [vmem:[#allocation2 + $0x64] sm:$0xf0]  ;;  %320 = vmatpush.bf16.msra.mxu2 %v632_v11  ;;  %v687_v22 = vld [vmem:[#allocation2 + $0xe0] sm:$0xf] }
  0x12   :  { %334 = vmatpush.bf16.msra.mxu3 %v696_v12  ;;  %v700_v20 = vor.u32 %v798_v15, %v697_v17  ;;  %v624_v21 = vor.u32 %v781_v19, %v623_v18  ;;  %v797_v23 = vld [vmem:[#allocation2 + $0xe4] sm:$0xf0]  ;;  %v780_v24 = vld [vmem:[#allocation2 + $0x64] sm:$0xf]  ;;  %571 = vmatmul.msk.bf16.vlgmr.msra.gmra.mxu0 %vm84_vm0, %v765_v5  ;;  %v625_v26 = vld [vmem:[#allocation2 + $0x68] sm:$0xf0] }
  0x13   :  { %v688_v25 = vor.u32 %v797_v23, %v687_v22  ;;  %v796_v27 = vld [vmem:[#allocation2 + $0xe4] sm:$0xf]  ;;  %v689_v28 = vld [vmem:[#allocation2 + $0xe8] sm:$0xf0]  ;;  %572 = vmatmul.msk.bf16.vlgmr.msra.gmra.mxu1 %vm84_vm0, %v765_v5  ;;  %348 = vmatpush.bf16.msrb.mxu0 %v636_v16  ;;  %v628_v29 = vor.u32 %v780_v24, %v625_v26  ;;  %v615_v30 = vld [vmem:[#allocation2 + $0x50] sm:$0xf] }
  0x14   :  { %v779_v31 = vld [vmem:[#allocation2 + $0x54] sm:$0xf0]  ;;  %v679_v32 = vld [vmem:[#allocation2 + $0xd0] sm:$0xf]  ;;  %362 = vmatpush.bf16.msrb.mxu1 %v700_v20  ;;  %v692_v33 = vor.u32 %v796_v27, %v689_v28  ;;  %v778_v35 = vld [vmem:[#allocation2 + $0x54] sm:$0xf] }
  0x15   :  { %v795_v34 = vld [vmem:[#allocation2 + $0xd4] sm:$0xf0]  ;;  %v617_v36 = vld [vmem:[#allocation2 + $0x58] sm:$0xf0]  ;;  %321 = vmatpush.bf16.msra.mxu2 %v624_v21  ;;  %v616_v37 = vor.u32 %v779_v31, %v615_v30  ;;  %v794_v39 = vld [vmem:[#allocation2 + $0xd4] sm:$0xf] }
  0x16   :  { %335 = vmatpush.bf16.msra.mxu3 %v688_v25  ;;  %v680_v38 = vor.u32 %v795_v34, %v679_v32  ;;  %v681_v40 = vld [vmem:[#allocation2 + $0xd8] sm:$0xf0]  ;;  %v607_v41 = vld [vmem:[#allocation2 + $0x40] sm:$0xf]  ;;  %v777_v42 = vld [vmem:[#allocation2 + $0x44] sm:$0xf0]  ;;  %v620_v45 = vor.u32 %v778_v35, %v617_v36 }
  0x17   :  { %v671_v43 = vld [vmem:[#allocation2 + $0xc0] sm:$0xf]  ;;  %v793_v44 = vld [vmem:[#allocation2 + $0xc4] sm:$0xf0]  ;;  %349 = vmatpush.bf16.msrb.mxu0 %v628_v29  ;;  %v684_v46 = vor.u32 %v794_v39, %v681_v40  ;;  %v776_v47 = vld [vmem:[#allocation2 + $0x44] sm:$0xf]  ;;  %v608_v49 = vor.u32 %v777_v42, %v607_v41 }
  0x18   :  { %363 = vmatpush.bf16.msrb.mxu1 %v692_v33  ;;  %v609_v48 = vld [vmem:[#allocation2 + $0x48] sm:$0xf0]  ;;  %v672_v50 = vor.u32 %v793_v44, %v671_v43  ;;  %v792_v51 = vld [vmem:[#allocation2 + $0xc4] sm:$0xf]  ;;  %v599_v55 = vld [vmem:[#allocation2 + $0x30] sm:$0xf] }
  0x19   :  { %322 = vmatpush.bf16.msra.mxu2 %v616_v37  ;;  %v673_v52 = vld [vmem:[#allocation2 + $0xc8] sm:$0xf0]  ;;  %v612_v53 = vor.u32 %v776_v47, %v609_v48  ;;  %v775_v56 = vld [vmem:[#allocation2 + $0x34] sm:$0xf0]  ;;  %v663_v57 = vld [vmem:[#allocation2 + $0xb0] sm:$0xf] }
  0x1a   :  { %336 = vmatpush.bf16.msra.mxu3 %v680_v38  ;;  %v676_v54 = vor.u32 %v792_v51, %v673_v52  ;;  %v600_v58 = vor.u32 %v775_v56, %v599_v55  ;;  %v791_v59 = vld [vmem:[#allocation2 + $0xb4] sm:$0xf0]  ;;  %v774_v60 = vld [vmem:[#allocation2 + $0x34] sm:$0xf]  ;;  %v601_v61 = vld [vmem:[#allocation2 + $0x38] sm:$0xf0] }
  0x1b   :  { %350 = vmatpush.bf16.msrb.mxu0 %v620_v45  ;;  %v664_v62 = vor.u32 %v791_v59, %v663_v57  ;;  %v604_v63 = vor.u32 %v774_v60, %v601_v61  ;;  %v790_v0 = vld [vmem:[#allocation2 + $0xb4] sm:$0xf]  ;;  %v665_v1 = vld [vmem:[#allocation2 + $0xb8] sm:$0xf0]  ;;  %v591_v3 = vld [vmem:[#allocation2 + $0x20] sm:$0xf] }
  0x1c   :  { %364 = vmatpush.bf16.msrb.mxu1 %v684_v46  ;;  %v668_v2 = vor.u32 %v790_v0, %v665_v1  ;;  %v773_v4 = vld [vmem:[#allocation2 + $0x24] sm:$0xf0]  ;;  %v655_v6 = vld [vmem:[#allocation2 + $0xa0] sm:$0xf]  ;;  %v772_v8 = vld [vmem:[#allocation2 + $0x24] sm:$0xf] }
  0x1d   :  { %323 = vmatpush.bf16.msra.mxu2 %v608_v49  ;;  %v592_v5 = vor.u32 %v773_v4, %v591_v3  ;;  %v789_v7 = vld [vmem:[#allocation2 + $0xa4] sm:$0xf0]  ;;  %v593_v10 = vld [vmem:[#allocation2 + $0x28] sm:$0xf0]  ;;  %v788_v11 = vld [vmem:[#allocation2 + $0xa4] sm:$0xf] }
  0x1e   :  { %337 = vmatpush.bf16.msra.mxu3 %v672_v50  ;;  %v656_v9 = vor.u32 %v789_v7, %v655_v6  ;;  %v657_v12 = vld [vmem:[#allocation2 + $0xa8] sm:$0xf0]  ;;  %v596_v13 = vor.u32 %v772_v8, %v593_v10  ;;  %v583_v15 = vld [vmem:[#allocation2 + $0x10] sm:$0xf]  ;;  %v771_v16 = vld [vmem:[#allocation2 + $0x14] sm:$0xf0] }
  0x1f   :  { %351 = vmatpush.bf16.msrb.mxu0 %v612_v53  ;;  %v660_v14 = vor.u32 %v788_v11, %v657_v12  ;;  %v647_v17 = vld [vmem:[#allocation2 + $0x90] sm:$0xf]  ;;  %v584_v18 = vor.u32 %v771_v16, %v583_v15  ;;  %v787_v19 = vld [vmem:[#allocation2 + $0x94] sm:$0xf0]  ;;  %v770_v20 = vld [vmem:[#allocation2 + $0x14] sm:$0xf] }
  0x20   :  { %365 = vmatpush.bf16.msrb.mxu1 %v676_v54  ;;  %v585_v21 = vld [vmem:[#allocation2 + $0x18] sm:$0xf0]  ;;  %v648_v22 = vor.u32 %v787_v19, %v647_v17  ;;  %v786_v24 = vld [vmem:[#allocation2 + $0x94] sm:$0xf]  ;;  %v575_v27 = vld [vmem:[#allocation2] sm:$0xf] }
  0x21   :  { %324 = vmatpush.bf16.msra.mxu2 %v600_v58  ;;  %v588_v23 = vor.u32 %v770_v20, %v585_v21  ;;  %v649_v25 = vld [vmem:[#allocation2 + $0x98] sm:$0xf0]  ;;  %v769_v28 = vld [vmem:[#allocation2 + $0x4] sm:$0xf0]  ;;  %v639_v29 = vld [vmem:[#allocation2 + $0x80] sm:$0xf] }
  0x22   :  { %338 = vmatpush.bf16.msra.mxu3 %v664_v62  ;;  %v652_v26 = vor.u32 %v786_v24, %v649_v25  ;;  %v576_v30 = vor.u32 %v769_v28, %v575_v27  ;;  %v785_v31 = vld [vmem:[#allocation2 + $0x84] sm:$0xf0]  ;;  %v768_v32 = vld [vmem:[#allocation2 + $0x4] sm:$0xf]  ;;  %v577_v33 = vld [vmem:[#allocation2 + $0x8] sm:$0xf0] }
  0x23   :  { %352 = vmatpush.bf16.msrb.mxu0 %v604_v63  ;;  %v640_v34 = vor.u32 %v785_v31, %v639_v29  ;;  %v580_v35 = vor.u32 %v768_v32, %v577_v33  ;;  %v784_v36 = vld [vmem:[#allocation2 + $0x84] sm:$0xf]  ;;  %v641_v37 = vld [vmem:[#allocation2 + $0x88] sm:$0xf0]  ;;  %v815_v39 = vld [vmem:[#allocation4 + $0x78] sm:$0xff] }
  0x24   :  { %366 = vmatpush.bf16.msrb.mxu1 %v668_v2  ;;  %v644_v38 = vor.u32 %v784_v36, %v641_v37  ;;  %v807_v40 = vld [vmem:[#allocation4 + $0x38] sm:$0xff]  ;;  %v814_v41 = vld [vmem:[#allocation4 + $0x70] sm:$0xff]  ;;  %v813_v43 = vld [vmem:[#allocation4 + $0x68] sm:$0xff] }
  0x25   :  { %325 = vmatpush.bf16.msra.mxu2 %v592_v5  ;;  %v806_v42 = vld [vmem:[#allocation4 + $0x30] sm:$0xff]  ;;  %v812_v44 = vld [vmem:[#allocation4 + $0x60] sm:$0xff]  ;;  %v805_v62 = vld [vmem:[#allocation4 + $0x28] sm:$0xff] }
  0x26   :  { %339 = vmatpush.bf16.msra.mxu3 %v656_v9  ;;  %v63_v45 = vld [vmem:[%s961_s2] sm:$0x3]  ;;  %v811_v63 = vld [vmem:[#allocation4 + $0x58] sm:$0xff]  ;;  %v810_v1 = vld [vmem:[#allocation4 + $0x50] sm:$0xff] }
  0x27   :  { %353 = vmatpush.bf16.msrb.mxu0 %v596_v13  ;;  %v65_v48 = vperm.slane %v63_v45, 0  ;;  %v66_v49 = vperm.slane %v63_v45, 1  ;;  %v804_v0 = vld [vmem:[#allocation4 + $0x20] sm:$0xff]  ;;  %v803_v2 = vld [vmem:[#allocation4 + $0x18] sm:$0xff]  ;;  %v809_v3 = vld [vmem:[#allocation4 + $0x48] sm:$0xff] }
  0x28   :  { %367 = vmatpush.bf16.msrb.mxu1 %v660_v14  ;;  %v802_v4 = vld [vmem:[#allocation4 + $0x10] sm:$0xff]  ;;  %v808_v5 = vld [vmem:[#allocation4 + $0x40] sm:$0xff]  ;;  %v801_v6 = vld [vmem:[#allocation4 + $0x8] sm:$0xff] }
  0x29   :  { %326 = vmatpush.bf16.msra.mxu2 %v584_v18  ;;  %v800_v7 = vld [vmem:[#allocation4] sm:$0xff] }
  0x2a   :  { %340 = vmatpush.bf16.msra.mxu3 %v648_v22  ;;  %v154_v8 = vld [vmem:[%s963_s4] sm:$0x3] }
  0x2b   :  { %354 = vmatpush.bf16.msrb.mxu0 %v588_v23  ;;  %v157_v10 = vperm.slane %v154_v8, 1  ;;  %v156_v14 = vperm.slane %v154_v8, 0  ;;  %v822_v33 = vld [vmem:[%s965_s6] ss:$0 sm:$0xff] }
  0x2c   :  { %368 = vmatpush.bf16.msrb.mxu1 %v652_v26 }
  0x2d   :  { %327 = vmatpush.bf16.msra.mxu2 %v576_v30 }
  0x2e   :  { %341 = vmatpush.bf16.msra.mxu3 %v640_v34  ;;  %v542_v34 = vlaneseq }
  0x2f   :  { %355 = vmatpush.bf16.msrb.mxu0 %v580_v35 }
  0x30   :  { %369 = vmatpush.bf16.msrb.mxu1 %v644_v38  ;;  %v543_v38 = vand.u32 127, %v542_v34 }
  0x31   :  { %514 = vmatpush.bf16.msrb.mxu2 %v807_v40 }
  0x32   :  { %528 = vmatpush.bf16.msrb.mxu3 %v815_v39  ;;  %vm548_vm1 = vcmp.ge.s32.totalorder %v543_v38, 8 }
  0x35   :  { %515 = vmatpush.bf16.msrb.mxu2 %v806_v42 }
  0x36   :  { %529 = vmatpush.bf16.msrb.mxu3 %v814_v41 }
  0x39   :  { %516 = vmatpush.bf16.msrb.mxu2 %v805_v62 }
  0x3a   :  { %530 = vmatpush.bf16.msrb.mxu3 %v813_v43 }
  0x3d   :  { %517 = vmatpush.bf16.msrb.mxu2 %v804_v0 }
  0x3e   :  { %531 = vmatpush.bf16.msrb.mxu3 %v812_v44 }
  0x41   :  { %518 = vmatpush.bf16.msrb.mxu2 %v803_v2 }
  0x42   :  { %532 = vmatpush.bf16.msrb.mxu3 %v811_v63 }
  0x45   :  { %519 = vmatpush.bf16.msrb.mxu2 %v802_v4 }
  0x46   :  { %533 = vmatpush.bf16.msrb.mxu3 %v810_v1 }
  0x49   :  { %520 = vmatpush.bf16.msrb.mxu2 %v801_v6 }
  0x4a   :  { %534 = vmatpush.bf16.msrb.mxu3 %v809_v3 }
  0x4d   :  { %521 = vmatpush.bf16.msrb.mxu2 %v800_v7 }
  0x4e   :  { %535 = vmatpush.bf16.msrb.mxu3 %v808_v5 }
  0x8f   :  { %v97_v46 = vpop.f32.mrf.mxu0 }
  0x90   :  { %v111_v47 = vpop.f32.mrf.mxu1  ;;  %v98_v50 = vadd.f32 %v97_v46, %v65_v48 }
  0x91   :  { %v112_v51 = vadd.f32 %v111_v47, %v66_v49 }
  0x92   :  { %v116_v56 = vmax.f32 %v98_v50, 0.0 }
  0x93   :  { %v117_v58 = vmax.f32 %v112_v51, 0.0 }
  0x97   :  { %v99_v52 = vpop.f32.mrf.mxu0 }
  0x98   :  { %v100_v53 = vadd.f32 %v99_v52, %v65_v48  ;;  %v113_v54 = vpop.f32.mrf.mxu1 }
  0x99   :  { %v114_v55 = vadd.f32 %v113_v54, %v66_v49 }
  0x9a   :  { %v118_v57 = vmax.f32 %v100_v53, 0.0 }
  0x9b   :  { %v119_v59 = vmax.f32 %v114_v55, 0.0 }
  0x9c   :  { %v120_v60 = vpack.c.bf16 %v118_v57, %v116_v56 }
  0x9d   :  { %v121_v61 = vpack.c.bf16 %v119_v59, %v117_v58 }
  0x9e   :  { %328 = vmatmul.bf16.vlgmr.msra.gmra.mxu2 %v120_v60  ;;  %356 = vmatmul.bf16.vlgmr.msrb.gmra.mxu0 %v120_v60 }
  0x9f   :  { %342 = vmatmul.bf16.vlgmr.msra.gmra.mxu3 %v121_v61  ;;  %370 = vmatmul.bf16.vlgmr.msrb.gmra.mxu1 %v121_v61 }
 0x11b   :  { %v357_v9 = vpop.f32.mrf.mxu0 }
 0x11c   :  { %v371_v11 = vpop.f32.mrf.mxu1  ;;  %v358_v12 = vadd.f32 %v357_v9, %v157_v10 }
 0x11e   :  { %v372_v17 = vadd.f32 %v371_v11, %v358_v12 }
 0x120   :  { %v377_v22 = vmax.f32 %v372_v17, 0.0 }
 0x121   :  { %v329_v13 = vpop.f32.mrf.mxu2 }
 0x122   :  { %v343_v15 = vpop.f32.mrf.mxu3  ;;  %v330_v20 = vadd.f32 %v329_v13, %v156_v14 }
 0x123   :  { %v359_v16 = vpop.f32.mrf.mxu0 }
 0x124   :  { %v360_v18 = vadd.f32 %v359_v16, %v157_v10  ;;  %v373_v19 = vpop.f32.mrf.mxu1  ;;  %v344_v25 = vadd.f32 %v343_v15, %v330_v20 }
 0x126   :  { %v374_v21 = vadd.f32 %v373_v19, %v360_v18  ;;  %v376_v30 = vmax.f32 %v344_v25, 0.0 }
 0x128   :  { %v379_v23 = vmax.f32 %v374_v21, 0.0 }
 0x129   :  { %v331_v24 = vpop.f32.mrf.mxu2 }
 0x12a   :  { %v381_v26 = vpack.c.bf16 %v379_v23, %v377_v22  ;;  %v332_v27 = vadd.f32 %v331_v24, %v156_v14  ;;  %v345_v28 = vpop.f32.mrf.mxu3 }
 0x12c   :  { %v346_v29 = vadd.f32 %v345_v28, %v332_v27  ;;  %536 = vmatmul.bf16.vlgmr.msrb.gmra.mxu3 %v381_v26 }
 0x12e   :  { %v378_v31 = vmax.f32 %v346_v29, 0.0 }
 0x130   :  { %v380_v32 = vpack.c.bf16 %v378_v31, %v376_v30 }
 0x132   :  { %522 = vmatmul.bf16.vlgmr.msrb.gmra.mxu2 %v380_v32 }
 0x1af   :  { %v537_v35 = vpop.f32.mrf.mxu3 }
 0x1b5   :  { %v523_v36 = vpop.f32.mrf.mxu2 }
 0x1b6   :  { %v524_v37 = vadd.f32 %v822_v33, %v523_v36 }
 0x1b7   :  { %v539_v45 = vpop.f32.mrf.mxu3 }
 0x1b8   :  { %v538_v39 = vadd.f32 %v537_v35, %v524_v37 }
 0x1ba   :  { %v544_v40 = vmax.f32 %v538_v39, -20.0 }
 0x1bc   :  { %v546_v41 = vmin.f32 %v544_v40, 2.0 }
 0x1bd   :  { %v525_v42 = vpop.f32.mrf.mxu2 }
 0x1be   :  { %v549_v43 = vsel %vm548_vm1, %v546_v41, %v538_v39  ;;  %v526_v44 = vadd.f32 %v822_v33, %v525_v42 }
 0x1bf   :  { %551 = vst [vmem:[%s966_s7] sm:$0xff] %v549_v43 }
 0x1c0   :  { %v540_v46 = vadd.f32 %v539_v45, %v526_v44 }
 0x1c2   :  { %v545_v47 = vmax.f32 %v540_v46, -20.0 }
 0x1c4   :  { %v547_v48 = vmin.f32 %v545_v47, 2.0 }
 0x1c6   :  { %v550_v49 = vsel %vm548_vm1, %v547_v48, %v540_v46 }
 0x1c7   :  { %552 = vst [vmem:[%s966_s7 + $0x8] sm:$0xff] %v550_v49 }
 0x1c8   :  { %557 = vsyncpa [#allocation3], 1 }
 0x1c9   :  { %558 = vsyncpa [#allocation5], 1 }

</bundles_post_ra>
